<compile_context>
chip_gen: v5e
topology: v5e:2x2
jax: 0.10.0
libtpu: 0.0.40
codegen_flags: <defaults>
</compile_context>

<pallas_src>
import math

import jax
import jax.numpy as jnp
from jax import lax
from jax.experimental import pallas as pl
from jax.experimental.pallas import tpu as pltpu


def _gelu_exact(x):
    # torch.nn.GELU default = exact erf formulation.
    return 0.5 * x * (1.0 + lax.erf(x * (1.0 / math.sqrt(2.0))))


def _fold_bn(conv_b, gamma, beta, mean, var, eps=1e-5):
    scale = gamma / jnp.sqrt(var + eps)
    bias = (conv_b - mean) * scale + beta
    return scale.astype(jnp.float32), bias.astype(jnp.float32)


def res_block(x, p):
    """x: (N, Cin, H, W) f32 (NCHW, PyTorch layout). Returns (N, Cout, H, W)."""
    N, Cin, H, W = x.shape
    Cmid = p["w1"].shape[-1]
    Cout = p["w3"].shape[-1]
    HW = H * W

    # ---- host-side prep: fold BN into weights, flatten channels-first ----
    s1, b1 = _fold_bn(p["b1"], *p["bn1"])
    s2, b2 = _fold_bn(p["b2"], *p["bn2"])
    s3, b3 = _fold_bn(p["b3"], *p["bn3"])
    # HWIO (3,3,Ci,Co) -> (Co, 9*Ci) with column order (dy*3+dx)*Ci + ci,
    # matching the im2col row order built in-kernel.
    w1f = (p["w1"] * s1).reshape(9 * Cin, Cmid).T            # (Cmid, 9*Cin)
    w2f = (p["w2"] * s2).reshape(9 * Cmid, Cmid).T           # (Cmid, 9*Cmid)
    w3f = (p["w3"] * s3).reshape(9 * Cmid, Cout).T           # (Cout, 9*Cmid)
    wsT = p["w_skip"].reshape(Cin, Cout).T                   # (Cout, Cin)
    w3s = jnp.concatenate([w3f, wsT], axis=1)                # fused conv3 + skip
    b1f = b1.reshape(Cmid, 1)
    b2f = b2.reshape(Cmid, 1)
    bof = (b3 + p["b_skip"]).reshape(Cout, 1)                # conv3(BN) + skip bias

    # Column-validity masks for the dx = -1 / +1 taps (shared by all stages).
    w_idx = jnp.arange(HW, dtype=jnp.int32) % W
    mask_l = (w_idx >= 1).astype(jnp.float32).reshape(1, HW)
    mask_r = (w_idx <= W - 2).astype(jnp.float32).reshape(1, HW)

    def kernel(x_ref, w1_ref, b1_ref, w2_ref, b2_ref, w3s_ref, bo_ref,
               ml_ref, mr_ref, o_ref):
        # x_ref  : (1, Cin, HW)  channels-first, lane-dense
        # w*_ref : flattened (Co, 9*Ci [+Cin]) weights, BN folded
        # o_ref  : (1, Cout, HW) lane-dense output
        ml = ml_ref[...]
        mr = mr_ref[...]

        def conv3x3(act, w_flat, extra=None):
            # act: (C, HW). Build im2col (9*C [+ Cex], HW) from a flat
            # row-padded copy + static lane slices, then ONE MXU matmul.
            C = act.shape[0]
            z = jnp.zeros((C, W + 1), jnp.float32)
            padded = jnp.concatenate([z, act, z], axis=1)    # (C, HW + 2W + 2)
            taps = []
            for dy in range(3):
                for dx in range(3):
                    s = (W + 1) + (dy - 1) * W + (dx - 1)
                    t = padded[:, s:s + HW]
                    if dx == 0:        # reads column w-1: invalid at w == 0
                        t = t * ml
                    elif dx == 2:      # reads column w+1: invalid at w == W-1
                        t = t * mr
                    taps.append(t)
            if extra is not None:      # fused 1x1 skip rows (stage 3)
                taps.append(extra)
            col = jnp.concatenate(taps, axis=0)              # (9C[+Cex], HW)
            return jnp.dot(w_flat, col, preferred_element_type=jnp.float32)

        xcf = x_ref[0]                                        # (Cin, HW)
        a1 = _gelu_exact(conv3x3(xcf, w1_ref[...]) + b1_ref[...])
        a2 = _gelu_exact(conv3x3(a1, w2_ref[...]) + b2_ref[...])
        y = conv3x3(a2, w3s_ref[...], extra=xcf) + bo_ref[...]
        o_ref[0] = _gelu_exact(y).astype(o_ref.dtype)

    out = pl.pallas_call(
        kernel,
        out_shape=jax.ShapeDtypeStruct((N, Cout, HW), x.dtype),
        grid=(N,),
        in_specs=[
            pl.BlockSpec((1, Cin, HW), lambda n: (n, 0, 0)),
            pl.BlockSpec((Cmid, 9 * Cin), lambda n: (0, 0)),
            pl.BlockSpec((Cmid, 1), lambda n: (0, 0)),
            pl.BlockSpec((Cmid, 9 * Cmid), lambda n: (0, 0)),
            pl.BlockSpec((Cmid, 1), lambda n: (0, 0)),
            pl.BlockSpec((Cout, 9 * Cmid + Cin), lambda n: (0, 0)),
            pl.BlockSpec((Cout, 1), lambda n: (0, 0)),
            pl.BlockSpec((1, HW), lambda n: (0, 0)),
            pl.BlockSpec((1, HW), lambda n: (0, 0)),
        ],
        out_specs=pl.BlockSpec((1, Cout, HW), lambda n: (n, 0, 0)),
        compiler_params=pltpu.CompilerParams(
            dimension_semantics=("parallel",)),
    )(x.reshape(N, Cin, HW), w1f, b1f, w2f, b2f, w3s, bof, mask_l, mask_r)

    # Pure reshape back to NCHW (no transpose); downstream consumers that can
    # take (N, Cout, H*W) channels-first can skip even this.
    return out.reshape(N, Cout, H, W)


def init_params(key, in_channels, out_channels):
    c_mid = in_channels * 2
    ks = jax.random.split(key, 11)

    def conv_w(k, kh, kw, ci, co):
        return 0.1 * jax.random.normal(k, (kh, kw, ci, co), jnp.float32)

    def bn_params(k, c):
        kg, kb, km, kv = jax.random.split(k, 4)
        gamma = jax.random.uniform(kg, (c,), jnp.float32, 0.5, 1.5)
        beta = 0.1 * jax.random.normal(kb, (c,), jnp.float32)
        mean = 0.1 * jax.random.normal(km, (c,), jnp.float32)
        var = jax.random.uniform(kv, (c,), jnp.float32, 0.5, 1.5)
        return gamma, beta, mean, var

    p = {}
    p["w1"] = conv_w(ks[0], 3, 3, in_channels, c_mid)
    p["b1"] = 0.1 * jax.random.normal(ks[1], (c_mid,), jnp.float32)
    p["bn1"] = bn_params(ks[2], c_mid)
    p["w2"] = conv_w(ks[3], 3, 3, c_mid, c_mid)
    p["b2"] = 0.1 * jax.random.normal(ks[4], (c_mid,), jnp.float32)
    p["bn2"] = bn_params(ks[5], c_mid)
    p["w3"] = conv_w(ks[6], 3, 3, c_mid, out_channels)
    p["b3"] = 0.1 * jax.random.normal(ks[7], (out_channels,), jnp.float32)
    p["bn3"] = bn_params(ks[8], out_channels)
    p["w_skip"] = conv_w(ks[9], 1, 1, in_channels, out_channels)
    p["b_skip"] = 0.1 * jax.random.normal(ks[10], (out_channels,), jnp.float32)
    return p


# ----------------------- pure-JAX reference (for checking) ------------------
def _conv_ref(x, w, b):
    # x: NCHW, w: HWIO
    y = lax.conv_general_dilated(
        x, w, window_strides=(1, 1), padding="SAME",
        dimension_numbers=("NCHW", "HWIO", "NCHW"))
    return y + b[None, :, None, None]


def res_block_ref(x, p):
    def bn(y, gamma, beta, mean, var, eps=1e-5):
        g = (gamma / jnp.sqrt(var + eps))[None, :, None, None]
        return (y - mean[None, :, None, None]) * g + beta[None, :, None, None]

    gelu = lambda v: jax.nn.gelu(v, approximate=False)
    h = gelu(bn(_conv_ref(x, p["w1"], p["b1"]), *p["bn1"]))
    h = gelu(bn(_conv_ref(h, p["w2"], p["b2"]), *p["bn2"]))
    main = bn(_conv_ref(h, p["w3"], p["b3"]), *p["bn3"])
    skip = _conv_ref(x, p["w_skip"], p["b_skip"])
    return gelu(main + skip)


if __name__ == "__main__":
    N, H, W = 2, 16, 16
    in_channels, out_channels = 4, 4

    key = jax.random.PRNGKey(0)
    k_x, k_p = jax.random.split(key)
    x = jax.random.normal(k_x, (N, in_channels, H, W), jnp.float32)
    params = init_params(k_p, in_channels, out_channels)

    out = jax.block_until_ready(jax.jit(res_block)(x, params))
    ref = jax.block_until_ready(res_block_ref(x, params))

    assert out.shape == (N, out_channels, H, W)
    err = jnp.max(jnp.abs(out - ref))
    assert jnp.allclose(out, ref, rtol=1e-4, atol=1e-4), f"max abs err = {err}"
    print("KERNEL_OK")
</pallas_src>

<mosaic_0001>
module attributes {stable_mosaic.version = 11 : i64} {
  func.func @kernel(%arg0: i32, %arg1: memref<1x4x256xf32, #tpu.memory_space<vmem>>, %arg2: memref<8x36xf32, #tpu.memory_space<vmem>>, %arg3: memref<8x1xf32, #tpu.memory_space<vmem>>, %arg4: memref<8x72xf32, #tpu.memory_space<vmem>>, %arg5: memref<8x1xf32, #tpu.memory_space<vmem>>, %arg6: memref<4x76xf32, #tpu.memory_space<vmem>>, %arg7: memref<4x1xf32, #tpu.memory_space<vmem>>, %arg8: memref<1x256xf32, #tpu.memory_space<vmem>>, %arg9: memref<1x256xf32, #tpu.memory_space<vmem>>, %arg10: memref<1x4x256xf32, #tpu.memory_space<vmem>>) attributes {dimension_semantics = [#tpu.dimension_semantics<parallel>], iteration_bounds = array<i64: 2>, scalar_prefetch = 0 : i64, scratch_operands = 0 : i64, tpu.core_type = #tpu.core_type<tc>, window_params = [{transform_indices = @transform_0, window_bounds = array<i64: 1, 4, 256>}, {pipeline_mode = #tpu.pipeline_mode<synchronous>, transform_indices = @transform_1, window_bounds = array<i64: 8, 36>}, {pipeline_mode = #tpu.pipeline_mode<synchronous>, transform_indices = @transform_2, window_bounds = array<i64: 8, 1>}, {pipeline_mode = #tpu.pipeline_mode<synchronous>, transform_indices = @transform_3, window_bounds = array<i64: 8, 72>}, {pipeline_mode = #tpu.pipeline_mode<synchronous>, transform_indices = @transform_4, window_bounds = array<i64: 8, 1>}, {pipeline_mode = #tpu.pipeline_mode<synchronous>, transform_indices = @transform_5, window_bounds = array<i64: 4, 76>}, {pipeline_mode = #tpu.pipeline_mode<synchronous>, transform_indices = @transform_6, window_bounds = array<i64: 4, 1>}, {pipeline_mode = #tpu.pipeline_mode<synchronous>, transform_indices = @transform_7, window_bounds = array<i64: 1, 256>}, {pipeline_mode = #tpu.pipeline_mode<synchronous>, transform_indices = @transform_8, window_bounds = array<i64: 1, 256>}, {transform_indices = @transform_9, window_bounds = array<i64: 1, 4, 256>}]} {
    %c0 = arith.constant 0 : index
    %c0_0 = arith.constant 0 : index
    %0 = vector.load %arg8[%c0, %c0_0] : memref<1x256xf32, #tpu.memory_space<vmem>>, vector<1x256xf32>
    %c0_1 = arith.constant 0 : index
    %c0_2 = arith.constant 0 : index
    %1 = vector.load %arg9[%c0_1, %c0_2] : memref<1x256xf32, #tpu.memory_space<vmem>>, vector<1x256xf32>
    %c0_3 = arith.constant 0 : index
    %c0_4 = arith.constant 0 : index
    %c0_5 = arith.constant 0 : index
    %2 = vector.load %arg1[%c0_3, %c0_4, %c0_5] : memref<1x4x256xf32, #tpu.memory_space<vmem>>, vector<1x4x256xf32>
    %3 = vector.shape_cast %2 : vector<1x4x256xf32> to vector<4x256xf32>
    %c0_6 = arith.constant 0 : index
    %c0_7 = arith.constant 0 : index
    %4 = vector.load %arg2[%c0_6, %c0_7] : memref<8x36xf32, #tpu.memory_space<vmem>>, vector<8x36xf32>
    %cst = arith.constant 0.000000e+00 : f32
    %5 = vector.broadcast %cst : f32 to vector<4x17xf32>
    %6 = tpu.concatenate %5, %3, %5 in 1 : vector<4x17xf32>, vector<4x256xf32>, vector<4x17xf32> -> vector<4x290xf32>
    %7 = vector.extract_strided_slice %6 {offsets = [0, 0], sizes = [4, 256], strides = [1, 1]} : vector<4x290xf32> to vector<4x256xf32>
    %8 = vector.broadcast %0 : vector<1x256xf32> to vector<4x256xf32>
    %9 = arith.mulf %7, %8 : vector<4x256xf32>
    %10 = vector.extract_strided_slice %6 {offsets = [0, 1], sizes = [4, 256], strides = [1, 1]} : vector<4x290xf32> to vector<4x256xf32>
    %11 = vector.extract_strided_slice %6 {offsets = [0, 2], sizes = [4, 256], strides = [1, 1]} : vector<4x290xf32> to vector<4x256xf32>
    %12 = vector.broadcast %1 : vector<1x256xf32> to vector<4x256xf32>
    %13 = arith.mulf %11, %12 : vector<4x256xf32>
    %14 = vector.extract_strided_slice %6 {offsets = [0, 16], sizes = [4, 256], strides = [1, 1]} : vector<4x290xf32> to vector<4x256xf32>
    %15 = vector.broadcast %0 : vector<1x256xf32> to vector<4x256xf32>
    %16 = arith.mulf %14, %15 : vector<4x256xf32>
    %17 = vector.extract_strided_slice %6 {offsets = [0, 17], sizes = [4, 256], strides = [1, 1]} : vector<4x290xf32> to vector<4x256xf32>
    %18 = vector.extract_strided_slice %6 {offsets = [0, 18], sizes = [4, 256], strides = [1, 1]} : vector<4x290xf32> to vector<4x256xf32>
    %19 = vector.broadcast %1 : vector<1x256xf32> to vector<4x256xf32>
    %20 = arith.mulf %18, %19 : vector<4x256xf32>
    %21 = vector.extract_strided_slice %6 {offsets = [0, 32], sizes = [4, 256], strides = [1, 1]} : vector<4x290xf32> to vector<4x256xf32>
    %22 = vector.broadcast %0 : vector<1x256xf32> to vector<4x256xf32>
    %23 = arith.mulf %21, %22 : vector<4x256xf32>
    %24 = vector.extract_strided_slice %6 {offsets = [0, 33], sizes = [4, 256], strides = [1, 1]} : vector<4x290xf32> to vector<4x256xf32>
    %25 = vector.extract_strided_slice %6 {offsets = [0, 34], sizes = [4, 256], strides = [1, 1]} : vector<4x290xf32> to vector<4x256xf32>
    %26 = vector.broadcast %1 : vector<1x256xf32> to vector<4x256xf32>
    %27 = arith.mulf %25, %26 : vector<4x256xf32>
    %28 = tpu.concatenate %9, %10, %13, %16, %17, %20, %23, %24, %27 in 0 : vector<4x256xf32>, vector<4x256xf32>, vector<4x256xf32>, vector<4x256xf32>, vector<4x256xf32>, vector<4x256xf32>, vector<4x256xf32>, vector<4x256xf32>, vector<4x256xf32> -> vector<36x256xf32>
    %cst_8 = arith.constant dense<0.000000e+00> : vector<8x256xf32>
    %29 = tpu.matmul %4, %28, %cst_8 {dimension_numbers = #tpu.dot_dimension_numbers<[1], [0], [0], [1], [0, 0, 1, 1], [], []>} : vector<8x36xf32>, vector<36x256xf32>, vector<8x256xf32> -> vector<8x256xf32>
    %c0_9 = arith.constant 0 : index
    %c0_10 = arith.constant 0 : index
    %30 = vector.load %arg3[%c0_9, %c0_10] : memref<8x1xf32, #tpu.memory_space<vmem>>, vector<8x1xf32>
    %31 = vector.broadcast %30 : vector<8x1xf32> to vector<8x256xf32>
    %32 = arith.addf %29, %31 : vector<8x256xf32>
    %cst_11 = arith.constant 5.000000e-01 : f32
    %33 = vector.broadcast %cst_11 : f32 to vector<8x256xf32>
    %34 = arith.mulf %33, %32 : vector<8x256xf32>
    %cst_12 = arith.constant 0.707106769 : f32
    %35 = vector.broadcast %cst_12 : f32 to vector<8x256xf32>
    %36 = arith.mulf %32, %35 : vector<8x256xf32>
    %37 = math.erf %36 : vector<8x256xf32>
    %cst_13 = arith.constant 1.000000e+00 : f32
    %38 = vector.broadcast %cst_13 : f32 to vector<8x256xf32>
    %39 = arith.addf %38, %37 : vector<8x256xf32>
    %40 = arith.mulf %34, %39 : vector<8x256xf32>
    %c0_14 = arith.constant 0 : index
    %c0_15 = arith.constant 0 : index
    %41 = vector.load %arg4[%c0_14, %c0_15] : memref<8x72xf32, #tpu.memory_space<vmem>>, vector<8x72xf32>
    %cst_16 = arith.constant 0.000000e+00 : f32
    %42 = vector.broadcast %cst_16 : f32 to vector<8x17xf32>
    %43 = tpu.concatenate %42, %40, %42 in 1 : vector<8x17xf32>, vector<8x256xf32>, vector<8x17xf32> -> vector<8x290xf32>
    %44 = vector.extract_strided_slice %43 {offsets = [0, 0], sizes = [8, 256], strides = [1, 1]} : vector<8x290xf32> to vector<8x256xf32>
    %45 = vector.broadcast %0 : vector<1x256xf32> to vector<8x256xf32>
    %46 = arith.mulf %44, %45 : vector<8x256xf32>
    %47 = vector.extract_strided_slice %43 {offsets = [0, 1], sizes = [8, 256], strides = [1, 1]} : vector<8x290xf32> to vector<8x256xf32>
    %48 = vector.extract_strided_slice %43 {offsets = [0, 2], sizes = [8, 256], strides = [1, 1]} : vector<8x290xf32> to vector<8x256xf32>
    %49 = vector.broadcast %1 : vector<1x256xf32> to vector<8x256xf32>
    %50 = arith.mulf %48, %49 : vector<8x256xf32>
    %51 = vector.extract_strided_slice %43 {offsets = [0, 16], sizes = [8, 256], strides = [1, 1]} : vector<8x290xf32> to vector<8x256xf32>
    %52 = vector.broadcast %0 : vector<1x256xf32> to vector<8x256xf32>
    %53 = arith.mulf %51, %52 : vector<8x256xf32>
    %54 = vector.extract_strided_slice %43 {offsets = [0, 17], sizes = [8, 256], strides = [1, 1]} : vector<8x290xf32> to vector<8x256xf32>
    %55 = vector.extract_strided_slice %43 {offsets = [0, 18], sizes = [8, 256], strides = [1, 1]} : vector<8x290xf32> to vector<8x256xf32>
    %56 = vector.broadcast %1 : vector<1x256xf32> to vector<8x256xf32>
    %57 = arith.mulf %55, %56 : vector<8x256xf32>
    %58 = vector.extract_strided_slice %43 {offsets = [0, 32], sizes = [8, 256], strides = [1, 1]} : vector<8x290xf32> to vector<8x256xf32>
    %59 = vector.broadcast %0 : vector<1x256xf32> to vector<8x256xf32>
    %60 = arith.mulf %58, %59 : vector<8x256xf32>
    %61 = vector.extract_strided_slice %43 {offsets = [0, 33], sizes = [8, 256], strides = [1, 1]} : vector<8x290xf32> to vector<8x256xf32>
    %62 = vector.extract_strided_slice %43 {offsets = [0, 34], sizes = [8, 256], strides = [1, 1]} : vector<8x290xf32> to vector<8x256xf32>
    %63 = vector.broadcast %1 : vector<1x256xf32> to vector<8x256xf32>
    %64 = arith.mulf %62, %63 : vector<8x256xf32>
    %65 = tpu.concatenate %46, %47, %50, %53, %54, %57, %60, %61, %64 in 0 : vector<8x256xf32>, vector<8x256xf32>, vector<8x256xf32>, vector<8x256xf32>, vector<8x256xf32>, vector<8x256xf32>, vector<8x256xf32>, vector<8x256xf32>, vector<8x256xf32> -> vector<72x256xf32>
    %cst_17 = arith.constant dense<0.000000e+00> : vector<8x256xf32>
    %66 = tpu.matmul %41, %65, %cst_17 {dimension_numbers = #tpu.dot_dimension_numbers<[1], [0], [0], [1], [0, 0, 1, 1], [], []>} : vector<8x72xf32>, vector<72x256xf32>, vector<8x256xf32> -> vector<8x256xf32>
    %c0_18 = arith.constant 0 : index
    %c0_19 = arith.constant 0 : index
    %67 = vector.load %arg5[%c0_18, %c0_19] : memref<8x1xf32, #tpu.memory_space<vmem>>, vector<8x1xf32>
    %68 = vector.broadcast %67 : vector<8x1xf32> to vector<8x256xf32>
    %69 = arith.addf %66, %68 : vector<8x256xf32>
    %cst_20 = arith.constant 5.000000e-01 : f32
    %70 = vector.broadcast %cst_20 : f32 to vector<8x256xf32>
    %71 = arith.mulf %70, %69 : vector<8x256xf32>
    %cst_21 = arith.constant 0.707106769 : f32
    %72 = vector.broadcast %cst_21 : f32 to vector<8x256xf32>
    %73 = arith.mulf %69, %72 : vector<8x256xf32>
    %74 = math.erf %73 : vector<8x256xf32>
    %cst_22 = arith.constant 1.000000e+00 : f32
    %75 = vector.broadcast %cst_22 : f32 to vector<8x256xf32>
    %76 = arith.addf %75, %74 : vector<8x256xf32>
    %77 = arith.mulf %71, %76 : vector<8x256xf32>
    %c0_23 = arith.constant 0 : index
    %c0_24 = arith.constant 0 : index
    %78 = vector.load %arg6[%c0_23, %c0_24] : memref<4x76xf32, #tpu.memory_space<vmem>>, vector<4x76xf32>
    %cst_25 = arith.constant 0.000000e+00 : f32
    %79 = vector.broadcast %cst_25 : f32 to vector<8x17xf32>
    %80 = tpu.concatenate %79, %77, %79 in 1 : vector<8x17xf32>, vector<8x256xf32>, vector<8x17xf32> -> vector<8x290xf32>
    %81 = vector.extract_strided_slice %80 {offsets = [0, 0], sizes = [8, 256], strides = [1, 1]} : vector<8x290xf32> to vector<8x256xf32>
    %82 = vector.broadcast %0 : vector<1x256xf32> to vector<8x256xf32>
    %83 = arith.mulf %81, %82 : vector<8x256xf32>
    %84 = vector.extract_strided_slice %80 {offsets = [0, 1], sizes = [8, 256], strides = [1, 1]} : vector<8x290xf32> to vector<8x256xf32>
    %85 = vector.extract_strided_slice %80 {offsets = [0, 2], sizes = [8, 256], strides = [1, 1]} : vector<8x290xf32> to vector<8x256xf32>
    %86 = vector.broadcast %1 : vector<1x256xf32> to vector<8x256xf32>
    %87 = arith.mulf %85, %86 : vector<8x256xf32>
    %88 = vector.extract_strided_slice %80 {offsets = [0, 16], sizes = [8, 256], strides = [1, 1]} : vector<8x290xf32> to vector<8x256xf32>
    %89 = vector.broadcast %0 : vector<1x256xf32> to vector<8x256xf32>
    %90 = arith.mulf %88, %89 : vector<8x256xf32>
    %91 = vector.extract_strided_slice %80 {offsets = [0, 17], sizes = [8, 256], strides = [1, 1]} : vector<8x290xf32> to vector<8x256xf32>
    %92 = vector.extract_strided_slice %80 {offsets = [0, 18], sizes = [8, 256], strides = [1, 1]} : vector<8x290xf32> to vector<8x256xf32>
    %93 = vector.broadcast %1 : vector<1x256xf32> to vector<8x256xf32>
    %94 = arith.mulf %92, %93 : vector<8x256xf32>
    %95 = vector.extract_strided_slice %80 {offsets = [0, 32], sizes = [8, 256], strides = [1, 1]} : vector<8x290xf32> to vector<8x256xf32>
    %96 = vector.broadcast %0 : vector<1x256xf32> to vector<8x256xf32>
    %97 = arith.mulf %95, %96 : vector<8x256xf32>
    %98 = vector.extract_strided_slice %80 {offsets = [0, 33], sizes = [8, 256], strides = [1, 1]} : vector<8x290xf32> to vector<8x256xf32>
    %99 = vector.extract_strided_slice %80 {offsets = [0, 34], sizes = [8, 256], strides = [1, 1]} : vector<8x290xf32> to vector<8x256xf32>
    %100 = vector.broadcast %1 : vector<1x256xf32> to vector<8x256xf32>
    %101 = arith.mulf %99, %100 : vector<8x256xf32>
    %102 = tpu.concatenate %83, %84, %87, %90, %91, %94, %97, %98, %101, %3 in 0 : vector<8x256xf32>, vector<8x256xf32>, vector<8x256xf32>, vector<8x256xf32>, vector<8x256xf32>, vector<8x256xf32>, vector<8x256xf32>, vector<8x256xf32>, vector<8x256xf32>, vector<4x256xf32> -> vector<76x256xf32>
    %cst_26 = arith.constant dense<0.000000e+00> : vector<4x256xf32>
    %103 = tpu.matmul %78, %102, %cst_26 {dimension_numbers = #tpu.dot_dimension_numbers<[1], [0], [0], [1], [0, 0, 1, 1], [], []>} : vector<4x76xf32>, vector<76x256xf32>, vector<4x256xf32> -> vector<4x256xf32>
    %c0_27 = arith.constant 0 : index
    %c0_28 = arith.constant 0 : index
    %104 = vector.load %arg7[%c0_27, %c0_28] : memref<4x1xf32, #tpu.memory_space<vmem>>, vector<4x1xf32>
    %105 = vector.broadcast %104 : vector<4x1xf32> to vector<4x256xf32>
    %106 = arith.addf %103, %105 : vector<4x256xf32>
    %cst_29 = arith.constant 5.000000e-01 : f32
    %107 = vector.broadcast %cst_29 : f32 to vector<4x256xf32>
    %108 = arith.mulf %107, %106 : vector<4x256xf32>
    %cst_30 = arith.constant 0.707106769 : f32
    %109 = vector.broadcast %cst_30 : f32 to vector<4x256xf32>
    %110 = arith.mulf %106, %109 : vector<4x256xf32>
    %111 = math.erf %110 : vector<4x256xf32>
    %cst_31 = arith.constant 1.000000e+00 : f32
    %112 = vector.broadcast %cst_31 : f32 to vector<4x256xf32>
    %113 = arith.addf %112, %111 : vector<4x256xf32>
    %114 = arith.mulf %108, %113 : vector<4x256xf32>
    %c0_32 = arith.constant 0 : index
    %c0_33 = arith.constant 0 : index
    %c0_34 = arith.constant 0 : index
    %115 = vector.load %arg10[%c0_32, %c0_33, %c0_34] : memref<1x4x256xf32, #tpu.memory_space<vmem>>, vector<1x4x256xf32>
    %116 = vector.shape_cast %115 : vector<1x4x256xf32> to vector<4x256xf32>
    %117 = vector.shape_cast %114 : vector<4x256xf32> to vector<1x4x256xf32>
    tpu.vector_store %arg10[%c0_32, %c0_33, %c0_34], %117 {strides = array<i32>} : memref<1x4x256xf32, #tpu.memory_space<vmem>>, vector<1x4x256xf32>,
    return
  }
  func.func @transform_0(%arg0: i32) -> (i32, i32, i32) {
    %c0_i32 = arith.constant 0 : i32
    %c0_i32_0 = arith.constant 0 : i32
    %c0_i32_1 = arith.constant 0 : i32
    return %arg0, %c0_i32, %c0_i32_0 : i32, i32, i32
  }
  func.func @transform_1(%arg0: i32) -> (i32, i32) {
    %c0_i32 = arith.constant 0 : i32
    %c0_i32_0 = arith.constant 0 : i32
    %c0_i32_1 = arith.constant 0 : i32
    return %c0_i32, %c0_i32_0 : i32, i32
  }
  func.func @transform_2(%arg0: i32) -> (i32, i32) {
    %c0_i32 = arith.constant 0 : i32
    %c0_i32_0 = arith.constant 0 : i32
    %c0_i32_1 = arith.constant 0 : i32
    return %c0_i32, %c0_i32_0 : i32, i32
  }
  func.func @transform_3(%arg0: i32) -> (i32, i32) {
    %c0_i32 = arith.constant 0 : i32
    %c0_i32_0 = arith.constant 0 : i32
    %c0_i32_1 = arith.constant 0 : i32
    return %c0_i32, %c0_i32_0 : i32, i32
  }
  func.func @transform_4(%arg0: i32) -> (i32, i32) {
    %c0_i32 = arith.constant 0 : i32
    %c0_i32_0 = arith.constant 0 : i32
    %c0_i32_1 = arith.constant 0 : i32
    return %c0_i32, %c0_i32_0 : i32, i32
  }
  func.func @transform_5(%arg0: i32) -> (i32, i32) {
    %c0_i32 = arith.constant 0 : i32
    %c0_i32_0 = arith.constant 0 : i32
    %c0_i32_1 = arith.constant 0 : i32
    return %c0_i32, %c0_i32_0 : i32, i32
  }
  func.func @transform_6(%arg0: i32) -> (i32, i32) {
    %c0_i32 = arith.constant 0 : i32
    %c0_i32_0 = arith.constant 0 : i32
    %c0_i32_1 = arith.constant 0 : i32
    return %c0_i32, %c0_i32_0 : i32, i32
  }
  func.func @transform_7(%arg0: i32) -> (i32, i32) {
    %c0_i32 = arith.constant 0 : i32
    %c0_i32_0 = arith.constant 0 : i32
    %c0_i32_1 = arith.constant 0 : i32
    return %c0_i32, %c0_i32_0 : i32, i32
  }
  func.func @transform_8(%arg0: i32) -> (i32, i32) {
    %c0_i32 = arith.constant 0 : i32
    %c0_i32_0 = arith.constant 0 : i32
    %c0_i32_1 = arith.constant 0 : i32
    return %c0_i32, %c0_i32_0 : i32, i32
  }
  func.func @transform_9(%arg0: i32) -> (i32, i32, i32) {
    %c0_i32 = arith.constant 0 : i32
    %c0_i32_0 = arith.constant 0 : i32
    %c0_i32_1 = arith.constant 0 : i32
    return %arg0, %c0_i32, %c0_i32_0 : i32, i32, i32
  }
}

</mosaic_0001>

<bundles_post_ra>
// kernel: res_block.1
= control target key start
LH: loop header
LB: loop body
LE: loop exit
PB: predicated region body
PF: predicated region fallthrough
CT: control target
= control target key end

     0   :  { %s1537_s30 = smov 0   ;;  %s1925_s0 = inlined_call_operand.vmem [shape: f32[2,4,256], index: 0, kind: input, shape index: {}]   ;;  %s1926_s1 = inlined_call_operand.vmem [shape: f32[8,36], index: 1, kind: input, shape index: {}]   ;;  %s1927_s2 = inlined_call_operand.vmem [shape: f32[8,1], index: 2, kind: input, shape index: {}]   ;;  %s1928_s3 = inlined_call_operand.vmem [shape: f32[8,72], index: 3, kind: input, shape index: {}]   ;;  %s1929_s4 = inlined_call_operand.vmem [shape: f32[8,1], index: 4, kind: input, shape index: {}]   ;;  %s1930_s5 = inlined_call_operand.vmem [shape: f32[4,76], index: 5, kind: input, shape index: {}]   ;;  %s1931_s6 = inlined_call_operand.vmem [shape: f32[4,1], index: 6, kind: input, shape index: {}]   ;;  %s1932_s7 = inlined_call_operand.vmem [shape: f32[1,256], index: 7, kind: input, shape index: {}]   ;;  %s1933_s8 = inlined_call_operand.vmem [shape: f32[1,256], index: 8, kind: input, shape index: {}]   ;;  %s1934_s9 = inlined_call_operand.vmem [shape: f32[2,4,256], index: 9, kind: output, shape index: {}]  }
   0x1 LB: > { %s1283_s10 = sadd.s32 4294967295, %s1470_s30   ;;  %p1287_p0 = scmp.ge.s32.totalorder %s1470_s30, 1  ;;  %s1470_s30 = sphi %s1537_s30, %s19_s30  }
   0x2   : > { %p287_p1 = scmp.lt.s32.totalorder %s1470_s30, 3 }
   0x4   : > { %p288_p2 = pnand %p1287_p0, %p287_p1 }
   0x5   : > { %p323_p3 = scmp.lt.s32.totalorder (!%p288_p2), %s1283_s10, 1  ;;  %s1472_s13 = smov (!%p288_p2), 34  }
   0x6   : > { %291 = sbr.rel (%p288_p2) target bundleno = 1413 (0x585), region = 56  ;;  %s1473_s15 = smov (!%p288_p2), 18  }
   0x7   : > { %s1474_s21 = smov (!%p288_p2), 17   ;;  %s1475_s22 = smov (!%p288_p2), 32  }
   0x8   : > { %s1476_s23 = smov (!%p288_p2), 16   ;;  %s1477_s24 = smov (!%p288_p2), 2  }
   0x9   : > { %s1478_s25 = smov (!%p288_p2), 94   ;;  %s1479_s26 = smov (!%p288_p2), 111  }
   0xa   : > { %s1480_s27 = smov (!%p288_p2), 96   ;;  %s1481_s28 = smov (!%p288_p2), 95  }
   0xb   : > { %v334_v0 = vld [vmem:[%s1933_s8] sm:$0x3]  ;;  %s1945_s10 = smov (!%p323_p3, %s1283_s10), 1  ;;  %vm345_vm0 = vcmask 138240   ;;  %vm414_vm1 = vcmask 277504   ;;  %vm402_vm2 = vcmask 261120  }
   0xc   : > { %v360_v1 = vperm.slane %v334_v0, 0  ;;  %s1310_s14 = sshll.u32 %s1945_s10, 3  ;;  %v361_v3 = vperm.slane %v334_v0, 1  ;;  %v333_v4 = vld [vmem:[%s1932_s7] sm:$0x3]  ;;  %vm366_vm3 = vcmask 15360  }
   0xd   : > { %s327_s18 = scalar_lea.vmem %s1925_s0, %s1310_s14  ;;  %v1560_v7 = vperm.slane %v333_v4, 1  ;;  %v1562_v8 = vperm.slane %v333_v4, 0  ;;  %vm378_vm4 = vcmask 130048   ;;  %vm390_vm5 = vcmask 146432   ;;  %s1482_s29 = smov 126  }
   0xe   : > { %410 = vrot.lane.b32.xlu1 %v360_v1, %s1472_s13  ;;  %386 = vrot.lane.b32.xlu2 %v360_v1, %s1473_s15  ;;  %v335_v2 = vld [vmem:[%s327_s18] sm:$0xff]  ;;  %s1483_s11 = smov 110   ;;  %s1484_s12 = smov 112   ;;  %vm531_vm6 = vcmask 769024   ;;  %vm1935_vm7 = vcmask 1043456   ;;  %vm506_vm8 = vcmask 785408  }
   0xf   : > { %338 = vst [vmem:[#allocation1] ss:$2 sm:$0xff] %v335_v2  ;;  %vm517_vm9 = vcmask 777216   ;;  %vm475_vm10 = vcmask 908288   ;;  %vm492_vm11 = vcmask 900096   ;;  %vm464_vm12 = vcmask 916480  }
  0x10   : > { %vm447_vm13 = vcmask 1031168   ;;  %vm1936_vm14 = vcmask 1039360   ;;  %vm549_vm15 = vcmask 293888  }
  0x16   : > { %412 = vrot.lane.b32.xlu1 %v361_v3, %s1472_s13  ;;  %388 = vrot.lane.b32.xlu2 %v361_v3, %s1473_s15  ;;  %v339_v5 = vld.sshfl [vmem:[#allocation1] sm:$0xff pattern:$0x75316420]  ;;  %v340_v6 = vld.sshfl [vmem:[#allocation1 + $0x8] sm:$0xff pattern:$0x75316420] }
  0x17   : > { %341 = vrot.lane.b32.xlu0 %v339_v5, %s1474_s21  ;;  %1077 = vst [vmem:[#allocation1] ss:$2 sm:$0xff] %v335_v2  ;;  %s1485_s13 = smov 127  }
  0x1e   : > { %400 = vrot.lane.b32.xlu1 %v1560_v7, %s1475_s22  ;;  %374 = vrot.lane.b32.xlu2 %v1562_v8, %s1476_s23 }
  0x1f   : > { %343 = vrot.lane.b32.xlu0 %v340_v6, %s1474_s21 }
  0x26   : > { %362 = vrot.lane.b32.xlu1 %v360_v1, %s1477_s24  ;;  %364 = vrot.lane.b32.xlu2 %v361_v3, %s1477_s24 }
  0x27   : > { %398 = vrot.lane.b32.xlu0 %v1562_v8, %s1475_s22 }
  0x2f   : > { %376 = vrot.lane.b32.xlu0 %v1560_v7, %s1476_s23 }
  0x68   : > { %v1571_v10 = vpop.permute.xlu2 %386 }
  0x70   : > { %v1580_v15 = vpop.permute.xlu2 %388 }
  0x71   : > { %v1649_v44 = vsel %vm390_vm5, %v1571_v10, %v1580_v15 }
  0x78   : > { %v1596_v21 = vpop.permute.xlu2 %374 }
  0x80   : > { %v1569_v9 = vpop.permute.xlu1 %410  ;;  %v1623_v33 = vpop.permute.xlu2 %364 }
  0x88   : > { %v1576_v13 = vpop.permute.xlu1 %412 }
  0x89   : > { %v342_v11 = vpop.permute.xlu0 %341  ;;  %v1604_v24 = vsel %vm414_vm1, %v1569_v9, %v1576_v13 }
  0x8a   : > { %v1574_v12 = vsel %vm345_vm0, 0.0, %v342_v11 }
  0x8b   : > { %v419_v14 = vmul.f32 %v1569_v9, %v1574_v12  ;;  %v424_v32 = vrot.slane %v1574_v12, 4  ;;  %v383_v47 = vmul.f32 %v1596_v21, %v1574_v12  ;;  %v395_v52 = vmul.f32 %v1571_v10, %v1574_v12 }
  0x8d   : > { %525 = vrot.lane.b32.xlu0 %v419_v14, %s1478_s25  ;;  %v455_v54 = vrot.slane %v383_v47, 4  ;;  %v483_v57 = vrot.slane %v395_v52, 4 }
  0x90   : > { %v1593_v20 = vpop.permute.xlu1 %400 }
  0x91   : > { %v344_v16 = vpop.permute.xlu0 %343 }
  0x92   : > { %v1584_v17 = vsel %vm345_vm0, %v342_v11, %v344_v16  ;;  %v1587_v18 = vsel %vm345_vm0, %v344_v16, 0.0 }
  0x93   : > { %473 = vrot.lane.b32.xlu2 %v1587_v18, %s1479_s26  ;;  %v1335_v19 = vpack.i.bf16 %v1584_v17, %v1574_v12  ;;  %v421_v23 = vmul.f32 %v1576_v13, %v1587_v18  ;;  %v420_v27 = vmul.f32 %v1604_v24, %v1584_v17  ;;  %v425_v30 = vrot.slane %v1584_v17, 4 }
  0x94   : > { %v409_v36 = vmul.f32 %v1593_v20, %v1587_v18  ;;  %v426_v39 = vrot.slane %v1587_v18, 4  ;;  %v397_v41 = vmul.f32 %v1580_v15, %v1587_v18  ;;  %v373_v48 = vmul.f32 %v1623_v33, %v1587_v18 }
  0x95   : > { %1336 = vrot.lane.b32.xlu1 %v1335_v19, %s1479_s26  ;;  %v1345_v34 = vpack.i.bf16 %v425_v30, %v424_v32  ;;  %v396_v50 = vmul.f32 %v1649_v44, %v1584_v17 }
  0x96   : > { %v485_v45 = vrot.slane %v397_v41, 4 }
  0x97   : > { %v484_v55 = vrot.slane %v396_v50, 4 }
  0x98   : > { %v1619_v31 = vpop.permute.xlu1 %362 }
  0x99   : > { %v1598_v22 = vpop.permute.xlu0 %398  ;;  %v1627_v35 = vsel %vm366_vm3, %v1619_v31, %v1623_v33  ;;  %v371_v37 = vmul.f32 %v1619_v31, %v1574_v12  ;;  %v1355_v58 = vpack.i.bf16 %v484_v55, %v483_v57 }
  0x9a   : > { %v1608_v25 = vsel %vm402_vm2, %v1598_v22, %v1593_v20  ;;  %v407_v26 = vmul.f32 %v1598_v22, %v1574_v12  ;;  %v372_v40 = vmul.f32 %v1627_v35, %v1584_v17 }
  0x9b   : > { %529 = vrot.lane.b32.xlu2 %v421_v23, %s1478_s25  ;;  %v408_v28 = vmul.f32 %v1608_v25, %v1584_v17  ;;  %v543_v23 = vld [vmem:[%s1927_s2] sm:$0xff] }
  0x9c   : > { %v1350_v43 = vpack.i.bf16 %v372_v40, %v371_v37 }
  0x9d   : > { %527 = vrot.lane.b32.xlu1 %v420_v27, %s1478_s25  ;;  %v1340_v29 = vpack.i.bf16 %v408_v28, %v407_v26  ;;  %v1486_v26 = vmov 0  }
  0x9e   : > { %1370 = vset.pattern.permute.xlu2 %v1486_v26  ;;  %1411 = vset.pattern.permute.xlu0 %v1486_v26 }
  0x9f   : > { %1341 = vrot.lane.b32.xlu0 %v1340_v29, %s1480_s27 }
  0xa1   : > { %v1634_v38 = vpop.permute.xlu0 %376 }
  0xa2   : > { %v1645_v42 = vsel %vm378_vm4, %v1596_v21, %v1634_v38  ;;  %v385_v49 = vmul.f32 %v1634_v38, %v1587_v18 }
  0xa3   : > { %1346 = vrot.lane.b32.xlu2 %v1345_v34, %s1481_s28  ;;  %v384_v46 = vmul.f32 %v1645_v42, %v1584_v17 }
  0xa4   : > { %v457_v53 = vrot.slane %v385_v49, 4 }
  0xa5   : > { %504 = vrot.lane.b32.xlu1 %v409_v36, %s1480_s27  ;;  %v456_v51 = vrot.slane %v384_v46, 4 }
  0xa7   : > { %515 = vrot.lane.b32.xlu0 %v426_v39, %s1481_s28  ;;  %v1360_v56 = vpack.i.bf16 %v456_v51, %v455_v54 }
  0xab   : > { %1351 = vrot.lane.b32.xlu2 %v1350_v43, %s1482_s29 }
  0xad   : > { %490 = vrot.lane.b32.xlu1 %v485_v45, %s1483_s11 }
  0xaf   : > { %445 = vrot.lane.b32.xlu0 %v373_v48, %s1482_s29 }
  0xb3   : > { %462 = vrot.lane.b32.xlu2 %v457_v53, %s1484_s12 }
  0xb5   : > { %1361 = vrot.lane.b32.xlu1 %v1360_v56, %s1484_s12 }
  0xb7   : > { %1356 = vrot.lane.b32.xlu0 %v1355_v58, %s1483_s11 }
  0xbb   : > { %546 = vperm.xlu2 %1370, %v543_v23  }
  0xbd   : > { %431 = vrot.lane.b32.xlu1 %v426_v39, %s1485_s13 }
  0xbf   : > { %1366 = vrot.lane.b32.xlu0 %v1345_v34, %s1485_s13 }
  0xed   : > { %v474_v59 = vpop.permute.xlu2 %473 }
  0xf5   : > { %v530_v60 = vpop.permute.xlu2 %529 }
  0xfd   : > { %v1347_v63 = vpop.permute.xlu2 %1346 }
  0xfe   : > { %v1349_v1 = vunpack.i.h.bf16 %v1347_v63  ;;  %v1348_v2 = vunpack.i.l.bf16 %v1347_v63 }
  0xff   : > { %v526_v62 = vpop.permute.xlu0 %525 }
 0x100   : > { %v518_v16 = vsel %vm517_vm9, %v1348_v2, %v1349_v1 }
 0x105   : > { %v1352_v34 = vpop.permute.xlu2 %1351 }
 0x106   : > { %v1354_v46 = vunpack.i.h.bf16 %v1352_v34  ;;  %v1353_v47 = vunpack.i.l.bf16 %v1352_v34 }
 0x107   : > { %v1337_v61 = vpop.permute.xlu1 %1336 }
 0x108   : > { %v1339_v37 = vunpack.i.h.bf16 %v1337_v61  ;;  %v1338_v39 = vunpack.i.l.bf16 %v1337_v61  ;;  %v448_v61 = vsel %vm447_vm13, %v1353_v47, %v1354_v46 }
 0x10a   : > { %v476_v51 = vsel %vm475_vm10, %v1338_v39, %v1339_v37  ;;  %v477_v52 = vsel %vm475_vm10, %v1339_v37, %v474_v59 }
 0x10d   : > { %v463_v50 = vpop.permute.xlu2 %462 }
 0x10f   : > { %v528_v0 = vpop.permute.xlu1 %527 }
 0x110   : > { %v532_v3 = vsel %vm531_vm6, %v526_v62, %v528_v0  ;;  %v533_v4 = vsel %vm531_vm6, %v528_v0, %v530_v60 }
 0x111   : > { %1292 = vmatpush.msk.msra.mxu2 %vm1935_vm7, %v532_v3  ;;  %1294 = vmatpush.msk.msra.mxu3 %vm1935_vm7, %v533_v4  ;;  %v1342_v5 = vpop.permute.xlu0 %1341  ;;  %v357_v3 = vmul.f32 %v1562_v8, %v1574_v12  ;;  %v358_v4 = vmul.f32 %v1560_v7, %v1584_v17 }
 0x112   : > { %v1344_v6 = vunpack.i.h.bf16 %v1342_v5  ;;  %v1343_v11 = vunpack.i.l.bf16 %v1342_v5 }
 0x114   : > { %v507_v14 = vsel %vm506_vm8, %v1343_v11, %v1344_v6  ;;  %v336_v11 = vld [vmem:[%s1926_s1] sm:$0xff] }
 0x115   : > { %v541_v18 = vsel %vm1935_vm7, %v507_v14, %v518_v16  ;;  %v547_v12 = vpop.permute.xlu2 %546 }
 0x116   : > { %569 = vmatpush.msra.mxu2 %v541_v18 }
 0x117   : > { %v505_v19 = vpop.permute.xlu1 %504 }
 0x118   : > { %v508_v28 = vsel %vm506_vm8, %v1344_v6, %v505_v19 }
 0x119   : > { %v516_v27 = vpop.permute.xlu0 %515 }
 0x11a   : > { %v519_v29 = vsel %vm517_vm9, %v1349_v1, %v516_v27 }
 0x11b   : > { %v542_v30 = vsel %vm1935_vm7, %v508_v28, %v519_v29 }
 0x11c   : > { %589 = vmatpush.msra.mxu3 %v542_v30 }
 0x11f   : > { %v491_v32 = vpop.permute.xlu1 %490 }
 0x121   : > { %v446_v36 = vpop.permute.xlu0 %445 }
 0x122   : > { %v449_v60 = vsel %vm447_vm13, %v1354_v46, %v446_v36 }
 0x127   : > { %v1362_v40 = vpop.permute.xlu1 %1361 }
 0x128   : > { %v1364_v41 = vunpack.i.h.bf16 %v1362_v40  ;;  %v1363_v43 = vunpack.i.l.bf16 %v1362_v40 }
 0x129   : > { %v1357_v45 = vpop.permute.xlu0 %1356 }
 0x12a   : > { %v1359_v48 = vunpack.i.h.bf16 %v1357_v45  ;;  %v1358_v49 = vunpack.i.l.bf16 %v1357_v45  ;;  %v465_v55 = vsel %vm464_vm12, %v1363_v43, %v1364_v41  ;;  %v466_v56 = vsel %vm464_vm12, %v1364_v41, %v463_v50 }
 0x12b   : > { %v537_v59 = vsel %vm1935_vm7, %v448_v61, %v465_v55  ;;  %v538_v62 = vsel %vm1935_vm7, %v449_v60, %v466_v56 }
 0x12c   : > { %v493_v53 = vsel %vm492_vm11, %v1358_v49, %v1359_v48  ;;  %v494_v54 = vsel %vm492_vm11, %v1359_v48, %v491_v32 }
 0x12d   : > { %v539_v57 = vsel %vm1935_vm7, %v476_v51, %v493_v53  ;;  %v540_v58 = vsel %vm1935_vm7, %v477_v52, %v494_v54 }
 0x12e   : > { %570 = vmatpush.msra.mxu2 %v539_v57  ;;  %590 = vmatpush.msra.mxu3 %v540_v58 }
 0x12f   : > { %v432_v2 = vpop.permute.xlu1 %431 }
 0x130   : > { %571 = vmatpush.msra.mxu2 %v537_v59  ;;  %591 = vmatpush.msra.mxu3 %v538_v62 }
 0x131   : > { %v1367_v63 = vpop.permute.xlu0 %1366 }
 0x132   : > { %v1369_v0 = vunpack.i.h.bf16 %v1367_v63  ;;  %v1368_v1 = vunpack.i.l.bf16 %v1367_v63 }
 0x134   : > { %v434_v5 = vsel %vm1936_vm14, %v1368_v1, %v1369_v0  ;;  %v435_v6 = vsel %vm1936_vm14, %v1369_v0, %v432_v2 }
 0x135   : > { %v535_v14 = vsel %vm1935_vm7, %v357_v3, %v434_v5  ;;  %v536_v16 = vsel %vm1935_vm7, %v358_v4, %v435_v6 }
 0x136   : > { %572 = vmatpush.msra.mxu2 %v535_v14  ;;  %592 = vmatpush.msra.mxu3 %v536_v16 }
 0x137   : > { %1293 = vmatmul.msk.f32.vlgmr.msra.gmra.mxu2 %vm549_vm15, %v336_v11  ;;  %1295 = vmatmul.msk.f32.vlgmr.msra.gmra.mxu3 %vm549_vm15, %v336_v11 }
 0x1ba   : > { %v574_v18 = vpop.f32.mrf.mxu2  ;;  %v594_v17 = vpop.f32.mrf.mxu3 }
 0x1bb   : > { %v1707_v19 = vadd.f32 %v574_v18, %v547_v12  ;;  %v1709_v23 = vadd.f32 %v594_v17, %v547_v12 }
 0x1bd   : > { %v1712_v26 = vmul.f32 0.70710677, %v1707_v19  ;;  %v1715_v27 = vmul.f32 0.70710677, %v1709_v23 }
 0x1bf   : > { %v601_v28 = vmul.f32 %v1712_v26, %v1712_v26  ;;  %v641_v29 = vmul.f32 %v1715_v27, %v1715_v27 }
 0x1c1   : > { %v602_v30 = vmin.f32 %v601_v28, 16.0  ;;  %v642_v32 = vmin.f32 %v641_v29, 16.0 }
 0x1c3   : > { %v603_v34 = vmul.f32 2.1237322e-06, %v602_v30  ;;  %v614_v36 = vmul.f32 3.8918573e-05, %v602_v30  ;;  %v643_v37 = vmul.f32 2.1237322e-06, %v642_v32 }
 0x1c4   : > { %v654_v39 = vmul.f32 3.8918573e-05, %v642_v32 }
 0x1c5   : > { %v604_v40 = vadd.f32 0.00028619796, %v603_v34  ;;  %v615_v41 = vadd.f32 0.001143296, %v614_v36  ;;  %v644_v43 = vadd.f32 0.00028619796, %v643_v37 }
 0x1c6   : > { %v655_v45 = vadd.f32 0.001143296, %v654_v39 }
 0x1c7   : > { %v605_v46 = vmul.f32 %v604_v40, %v602_v30  ;;  %v616_v47 = vmul.f32 %v615_v41, %v602_v30  ;;  %v645_v48 = vmul.f32 %v644_v43, %v642_v32 }
 0x1c8   : > { %v656_v49 = vmul.f32 %v655_v45, %v642_v32 }
 0x1c9   : > { %v606_v50 = vadd.f32 0.0036580483, %v605_v46  ;;  %v617_v51 = vadd.f32 0.014752088, %v616_v47  ;;  %v646_v54 = vadd.f32 0.0036580483, %v645_v48 }
 0x1ca   : > { %v657_v52 = vadd.f32 0.014752088, %v656_v49 }
 0x1cb   : > { %v618_v53 = vmul.f32 %v617_v51, %v602_v30  ;;  %v607_v56 = vmul.f32 %v606_v50, %v602_v30  ;;  %v647_v61 = vmul.f32 %v646_v54, %v642_v32 }
 0x1cc   : > { %v658_v55 = vmul.f32 %v657_v52, %v642_v32 }
 0x1cd   : > { %v619_v57 = vadd.f32 0.112945676, %v618_v53  ;;  %v608_v62 = vadd.f32 0.05243302, %v607_v56  ;;  %v648_v2 = vadd.f32 0.05243302, %v647_v61 }
 0x1ce   : > { %v659_v58 = vadd.f32 0.112945676, %v658_v55 }
 0x1cf   : > { %v620_v60 = vmul.f32 %v619_v57, %v602_v30  ;;  %v609_v4 = vmul.f32 %v608_v62, %v602_v30  ;;  %v649_v11 = vmul.f32 %v648_v2, %v642_v32 }
 0x1d0   : > { %v660_v59 = vmul.f32 %v659_v58, %v642_v32 }
 0x1d1   : > { %v621_v63 = vadd.f32 0.4994258, %v620_v60  ;;  %v610_v14 = vadd.f32 0.18741608, %v609_v4  ;;  %v650_v16 = vadd.f32 0.18741608, %v649_v11 }
 0x1d2   : > { %v661_v0 = vadd.f32 0.4994258, %v660_v59  ;;  %v597_v59 = vmul.f32 0.5, %v1707_v19 }
 0x1d3   : > { %v622_v1 = vmul.f32 %v621_v63, %v602_v30  ;;  %v611_v18 = vmul.f32 %v610_v14, %v602_v30  ;;  %v651_v29 = vmul.f32 %v650_v16, %v642_v32  ;;  %v598_v63 = vmul.f32 0.5, %v1709_v23 }
 0x1d4   : > { %v662_v3 = vmul.f32 %v661_v0, %v642_v32 }
 0x1d5   : > { %v623_v5 = vadd.f32 1.0, %v622_v1  ;;  %v612_v37 = vadd.f32 1.1283791, %v611_v18  ;;  %v652_v46 = vadd.f32 1.1283791, %v651_v29 }
 0x1d6   : > { %v663_v6 = vadd.f32 1.0, %v662_v3 }
 0x1d7   : > { %1452 = vrcp.f32 %v623_v5  ;;  %v635_v39 = vand.u32 2147483648, %v623_v5  ;;  %v633_v43 = vand.u32 2147483647, %v623_v5  ;;  %vm629_vm3 = vweird.f32 %v623_v5 }
 0x1d8   : > { %1454 = vrcp.f32 %v663_v6  ;;  %v675_v45 = vand.u32 2147483648, %v663_v6  ;;  %v673_v48 = vand.u32 2147483647, %v663_v6  ;;  %vm669_vm5 = vweird.f32 %v663_v6 }
 0x1d9   : > { %v636_v30 = vor.u32 1.1754944e-38, %v635_v39  ;;  %v613_v32 = vmul.f32 %v612_v37, %v1712_v26  ;;  %vm634_vm15 = vcmp.eq.f32.partialorder %v633_v43, 8.507059e+37  ;;  %v653_v54 = vmul.f32 %v652_v46, %v1715_v27 }
 0x1da   : > { %v676_v52 = vor.u32 1.1754944e-38, %v675_v45  ;;  %vm674_vm14 = vcmp.eq.f32.partialorder %v673_v48, 8.507059e+37 }
 0x1dd   : > { %v1453_v12 = vpop.eup %1452 }
 0x1de   : > { %v1455_v17 = vpop.eup %1454  ;;  %v625_v28 = vmul.f32 %v1453_v12, %v623_v5  ;;  %vm630_vm1 = vweird.f32 %v1453_v12 }
 0x1df   : > { %v665_v34 = vmul.f32 %v1455_v17, %v663_v6  ;;  %vm670_vm2 = vweird.f32 %v1455_v17  ;;  %vm631_vm4 = vmor %vm629_vm3, %vm630_vm1  ;;  %vm818_vm1 = vcmask 588800  }
 0x1e0   : > { %v626_v36 = vsub.f32 1.0, %v625_v28  ;;  %vm671_vm7 = vmor %vm669_vm5, %vm670_vm2 }
 0x1e1   : > { %v666_v40 = vsub.f32 1.0, %v665_v34 }
 0x1e2   : > { %v627_v41 = vmul.f32 %v1453_v12, %v626_v36 }
 0x1e3   : > { %v667_v47 = vmul.f32 %v1455_v17, %v666_v40 }
 0x1e4   : > { %v628_v49 = vadd.f32 %v1453_v12, %v627_v41 }
 0x1e5   : > { %v668_v50 = vadd.f32 %v1455_v17, %v667_v47 }
 0x1e6   : > { %v632_v51 = vsel %vm631_vm4, %v1453_v12, %v628_v49 }
 0x1e7   : > { %v637_v53 = vsel %vm634_vm15, %v636_v30, %v632_v51  ;;  %v672_v55 = vsel %vm671_vm7, %v1455_v17, %v668_v50  ;;  %vm1937_vm7 = vcmask 1039360  }
 0x1e8   : > { %v638_v56 = vmul.f32 %v637_v53, %v613_v32  ;;  %v677_v57 = vsel %vm674_vm14, %v676_v52, %v672_v55  ;;  %vm1938_vm14 = vmmov %vm1937_vm7 }
 0x1e9   : > { %v678_v58 = vmul.f32 %v677_v57, %v653_v54 }
 0x1ea   : > { %v1296_v60 = vclamps-f32 %v638_v56, 1.0 }
 0x1eb   : > { %v1297_v61 = vclamps-f32 %v678_v58, 1.0 }
 0x1ec   : > { %v681_v62 = vadd.f32 1.0, %v1296_v60 }
 0x1ed   : > { %v682_v26 = vadd.f32 1.0, %v1297_v61  ;;  %v812_v61 = vld [vmem:[%s1929_s4] sm:$0xff] }
 0x1ee   : > { %v683_v0 = vmul.f32 %v681_v62, %v597_v59 }
 0x1ef   : > { %v684_v1 = vmul.f32 %v682_v26, %v598_v63 }
 0x1f0   : > { %688 = vrot.lane.b32.xlu0 %v683_v0, %s1474_s21 }
 0x1f1   : > { %690 = vrot.lane.b32.xlu1 %v684_v1, %s1474_s21 }
 0x262   : > { %v689_v27 = vpop.permute.xlu0 %688 }
 0x263   : > { %v691_v2 = vpop.permute.xlu1 %690  ;;  %v1728_v3 = vsel %vm345_vm0, 0.0, %v689_v27 }
 0x264   : > { %v697_v4 = vsel %vm345_vm0, %v691_v2, 0.0  ;;  %v1732_v5 = vsel %vm345_vm0, %v689_v27, %v691_v2  ;;  %v709_v6 = vmul.f32 %v1728_v3, %v1598_v22  ;;  %v712_v16 = vmul.f32 %v1728_v3, %v1569_v9 }
 0x265   : > { %793 = vrot.lane.b32.xlu2 %v697_v4, %s1481_s28  ;;  %v714_v19 = vmul.f32 %v697_v4, %v1576_v13  ;;  %v1371_v23 = vpack.i.bf16 %v1732_v5, %v1728_v3  ;;  %v710_v11 = vmul.f32 %v1732_v5, %v1608_v25  ;;  %v713_v12 = vmul.f32 %v1732_v5, %v1604_v24 }
 0x266   : > { %v711_v17 = vmul.f32 %v697_v4, %v1593_v20  ;;  %v708_v28 = vmul.f32 %v697_v4, %v1580_v15  ;;  %v706_v29 = vmul.f32 %v1728_v3, %v1571_v10  ;;  %v707_v34 = vmul.f32 %v1732_v5, %v1649_v44 }
 0x267   : > { %806 = vrot.lane.b32.xlu0 %v714_v19, %s1478_s25  ;;  %1372 = vrot.lane.b32.xlu1 %v1371_v23, %s1481_s28  ;;  %v1386_v14 = vpack.i.bf16 %v710_v11, %v709_v6  ;;  %v1381_v18 = vpack.i.bf16 %v713_v12, %v712_v16  ;;  %v703_v36 = vmul.f32 %v1728_v3, %v1596_v21 }
 0x268   : > { %v704_v37 = vmul.f32 %v1732_v5, %v1645_v42  ;;  %v1391_v39 = vpack.i.bf16 %v707_v34, %v706_v29  ;;  %v705_v40 = vmul.f32 %v697_v4, %v1634_v38  ;;  %v700_v43 = vmul.f32 %v1728_v3, %v1619_v31 }
 0x269   : > { %v701_v45 = vmul.f32 %v1732_v5, %v1627_v35  ;;  %v702_v47 = vmul.f32 %v697_v4, %v1623_v33 }
 0x26a   : > { %v1396_v41 = vpack.i.bf16 %v704_v37, %v703_v36 }
 0x26b   : > { %v1401_v46 = vpack.i.bf16 %v701_v45, %v700_v43 }
 0x26d   : > { %757 = vrot.lane.b32.xlu2 %v697_v4, %s1479_s26 }
 0x26f   : > { %1377 = vrot.lane.b32.xlu1 %v1371_v23, %s1479_s26  ;;  %1387 = vrot.lane.b32.xlu0 %v1386_v14, %s1480_s27 }
 0x275   : > { %1382 = vrot.lane.b32.xlu2 %v1381_v18, %s1478_s25 }
 0x277   : > { %783 = vrot.lane.b32.xlu1 %v711_v17, %s1480_s27  ;;  %770 = vrot.lane.b32.xlu0 %v708_v28, %s1483_s11 }
 0x27d   : > { %1392 = vrot.lane.b32.xlu2 %v1391_v39, %s1483_s11 }
 0x27f   : > { %747 = vrot.lane.b32.xlu1 %v705_v40, %s1484_s12  ;;  %1397 = vrot.lane.b32.xlu0 %v1396_v41, %s1484_s12 }
 0x285   : > { %1402 = vrot.lane.b32.xlu2 %v1401_v46, %s1482_s29 }
 0x287   : > { %1407 = vrot.lane.b32.xlu1 %v1371_v23, %s1485_s13  ;;  %734 = vrot.lane.b32.xlu0 %v702_v47, %s1482_s29 }
 0x28d   : > { %721 = vrot.lane.b32.xlu2 %v697_v4, %s1485_s13 }
 0x28f   : > { %815 = vperm.xlu0 %1411, %v812_v61  }
 0x2bf   : > { %v794_v48 = vpop.permute.xlu2 %793 }
 0x2c7   : > { %v758_v49 = vpop.permute.xlu2 %757 }
 0x2cf   : > { %v1383_v30 = vpop.permute.xlu2 %1382 }
 0x2d0   : > { %v1385_v50 = vunpack.i.h.bf16 %v1383_v30  ;;  %v1384_v32 = vunpack.i.l.bf16 %v1383_v30 }
 0x2d2   : > { %v808_v51 = vsel %vm531_vm6, %v1384_v32, %v1385_v50  ;;  %v698_v32 = vmul.f32 %v1728_v3, %v1562_v8 }
 0x2d3   : > { %829 = vmatpush.msrb.mxu2 %v808_v51  ;;  %v699_v51 = vmul.f32 %v1732_v5, %v1560_v7 }
 0x2d7   : > { %v1393_v60 = vpop.permute.xlu2 %1392 }
 0x2d8   : > { %v1395_v63 = vunpack.i.h.bf16 %v1393_v60  ;;  %v1394_v26 = vunpack.i.l.bf16 %v1393_v60 }
 0x2d9   : > { %v1373_v52 = vpop.permute.xlu1 %1372  ;;  %v807_v53 = vpop.permute.xlu0 %806 }
 0x2da   : > { %v1375_v54 = vunpack.i.h.bf16 %v1373_v52  ;;  %v1374_v55 = vunpack.i.l.bf16 %v1373_v52  ;;  %v809_v56 = vsel %vm531_vm6, %v1385_v50, %v807_v53  ;;  %v772_v19 = vsel %vm492_vm11, %v1394_v26, %v1395_v63  ;;  %v685_v52 = vld [vmem:[%s1928_s3] sm:$0xff] }
 0x2db   : > { %849 = vmatpush.msrb.mxu3 %v809_v56 }
 0x2dc   : > { %v795_v57 = vsel %vm517_vm9, %v1374_v55, %v1375_v54  ;;  %v796_v58 = vsel %vm517_vm9, %v1375_v54, %v794_v48 }
 0x2dd   : > { %830 = vmatpush.msrb.mxu2 %v795_v57  ;;  %850 = vmatpush.msrb.mxu3 %v796_v58 }
 0x2df   : > { %v1403_v18 = vpop.permute.xlu2 %1402 }
 0x2e0   : > { %v1405_v29 = vunpack.i.h.bf16 %v1403_v18  ;;  %v1404_v34 = vunpack.i.l.bf16 %v1403_v18 }
 0x2e1   : > { %v1378_v59 = vpop.permute.xlu1 %1377  ;;  %v1388_v62 = vpop.permute.xlu0 %1387 }
 0x2e2   : > { %v1390_v0 = vunpack.i.h.bf16 %v1388_v62  ;;  %v1389_v1 = vunpack.i.l.bf16 %v1388_v62  ;;  %v1380_v27 = vunpack.i.h.bf16 %v1378_v59  ;;  %v1379_v2 = vunpack.i.l.bf16 %v1378_v59 }
 0x2e3   : > { %v736_v41 = vsel %vm447_vm13, %v1404_v34, %v1405_v29 }
 0x2e4   : > { %v785_v4 = vsel %vm506_vm8, %v1389_v1, %v1390_v0  ;;  %v759_v23 = vsel %vm475_vm10, %v1379_v2, %v1380_v27  ;;  %v760_v12 = vsel %vm475_vm10, %v1380_v27, %v758_v49 }
 0x2e5   : > { %831 = vmatpush.msrb.mxu2 %v785_v4 }
 0x2e7   : > { %832 = vmatpush.msrb.mxu2 %v772_v19  ;;  %v722_v49 = vpop.permute.xlu2 %721 }
 0x2e9   : > { %v784_v6 = vpop.permute.xlu1 %783  ;;  %v771_v11 = vpop.permute.xlu0 %770  ;;  %833 = vmatpush.msrb.mxu2 %v759_v23 }
 0x2ea   : > { %v786_v14 = vsel %vm506_vm8, %v1390_v0, %v784_v6  ;;  %v773_v16 = vsel %vm492_vm11, %v1395_v63, %v771_v11 }
 0x2eb   : > { %851 = vmatpush.msrb.mxu3 %v786_v14 }
 0x2ed   : > { %852 = vmatpush.msrb.mxu3 %v773_v16 }
 0x2ef   : > { %853 = vmatpush.msrb.mxu3 %v760_v12 }
 0x2f1   : > { %v748_v17 = vpop.permute.xlu1 %747  ;;  %v1398_v28 = vpop.permute.xlu0 %1397 }
 0x2f2   : > { %v1400_v36 = vunpack.i.h.bf16 %v1398_v28  ;;  %v1399_v37 = vunpack.i.l.bf16 %v1398_v28 }
 0x2f4   : > { %v749_v39 = vsel %vm464_vm12, %v1399_v37, %v1400_v36  ;;  %v750_v40 = vsel %vm464_vm12, %v1400_v36, %v748_v17 }
 0x2f5   : > { %834 = vmatpush.msrb.mxu2 %v749_v39  ;;  %854 = vmatpush.msrb.mxu3 %v750_v40 }
 0x2f7   : > { %835 = vmatpush.msrb.mxu2 %v736_v41 }
 0x2f9   : > { %v1408_v43 = vpop.permute.xlu1 %1407  ;;  %v735_v45 = vpop.permute.xlu0 %734 }
 0x2fa   : > { %v1410_v46 = vunpack.i.h.bf16 %v1408_v43  ;;  %v1409_v47 = vunpack.i.l.bf16 %v1408_v43  ;;  %v737_v48 = vsel %vm447_vm13, %v1405_v29, %v735_v45 }
 0x2fb   : > { %855 = vmatpush.msrb.mxu3 %v737_v48 }
 0x2fc   : > { %v723_v30 = vsel %vm1937_vm7, %v1409_v47, %v1410_v46  ;;  %v724_v50 = vsel %vm1938_vm14, %v1410_v46, %v722_v49 }
 0x2fd   : > { %836 = vmatpush.msrb.mxu2 %v723_v30  ;;  %856 = vmatpush.msrb.mxu3 %v724_v50 }
 0x2ff   : > { %837 = vmatpush.msrb.mxu2 %v698_v32  ;;  %857 = vmatpush.msrb.mxu3 %v699_v51 }
 0x300   : > { %1298 = vmatmul.msk.f32.vlgmr.msrb.gmra.mxu2 %vm818_vm1, %v685_v52  ;;  %1299 = vmatmul.msk.f32.vlgmr.msrb.gmra.mxu3 %vm818_vm1, %v685_v52 }
 0x301   : > { %v816_v53 = vpop.permute.xlu0 %815 }
 0x383   : > { %v839_v54 = vpop.f32.mrf.mxu2  ;;  %v859_v55 = vpop.f32.mrf.mxu3 }
 0x384   : > { %v1803_v56 = vadd.f32 %v839_v54, %v816_v53  ;;  %v1805_v57 = vadd.f32 %v859_v55, %v816_v53 }
 0x386   : > { %v1808_v3 = vmul.f32 0.70710677, %v1803_v56  ;;  %v1811_v5 = vmul.f32 0.70710677, %v1805_v57 }
 0x388   : > { %v866_v58 = vmul.f32 %v1808_v3, %v1808_v3  ;;  %v906_v60 = vmul.f32 %v1811_v5, %v1811_v5 }
 0x38a   : > { %v867_v61 = vmin.f32 %v866_v58, 16.0  ;;  %v907_v59 = vmin.f32 %v906_v60, 16.0 }
 0x38c   : > { %v868_v62 = vmul.f32 2.1237322e-06, %v867_v61  ;;  %v879_v63 = vmul.f32 3.8918573e-05, %v867_v61  ;;  %v908_v26 = vmul.f32 2.1237322e-06, %v907_v59 }
 0x38d   : > { %v919_v0 = vmul.f32 3.8918573e-05, %v907_v59 }
 0x38e   : > { %v869_v1 = vadd.f32 0.00028619796, %v868_v62  ;;  %v880_v27 = vadd.f32 0.001143296, %v879_v63  ;;  %v909_v2 = vadd.f32 0.00028619796, %v908_v26 }
 0x38f   : > { %v920_v4 = vadd.f32 0.001143296, %v919_v0 }
 0x390   : > { %v870_v19 = vmul.f32 %v869_v1, %v867_v61  ;;  %v881_v23 = vmul.f32 %v880_v27, %v867_v61  ;;  %v910_v6 = vmul.f32 %v909_v2, %v907_v59 }
 0x391   : > { %v921_v11 = vmul.f32 %v920_v4, %v907_v59 }
 0x392   : > { %v871_v14 = vadd.f32 0.0036580483, %v870_v19  ;;  %v882_v16 = vadd.f32 0.014752088, %v881_v23  ;;  %v911_v17 = vadd.f32 0.0036580483, %v910_v6 }
 0x393   : > { %v922_v12 = vadd.f32 0.014752088, %v921_v11 }
 0x394   : > { %v883_v18 = vmul.f32 %v882_v16, %v867_v61  ;;  %v872_v29 = vmul.f32 %v871_v14, %v867_v61  ;;  %v912_v39 = vmul.f32 %v911_v17, %v907_v59 }
 0x395   : > { %v923_v28 = vmul.f32 %v922_v12, %v907_v59 }
 0x396   : > { %v884_v34 = vadd.f32 0.112945676, %v883_v18  ;;  %v873_v41 = vadd.f32 0.05243302, %v872_v29  ;;  %v913_v47 = vadd.f32 0.05243302, %v912_v39 }
 0x397   : > { %v924_v36 = vadd.f32 0.112945676, %v923_v28 }
 0x398   : > { %v885_v37 = vmul.f32 %v884_v34, %v867_v61  ;;  %v874_v49 = vmul.f32 %v873_v41, %v867_v61  ;;  %v914_v32 = vmul.f32 %v913_v47, %v907_v59 }
 0x399   : > { %v925_v40 = vmul.f32 %v924_v36, %v907_v59 }
 0x39a   : > { %v886_v43 = vadd.f32 0.4994258, %v885_v37  ;;  %v875_v51 = vadd.f32 0.18741608, %v874_v49  ;;  %v915_v52 = vadd.f32 0.18741608, %v914_v32 }
 0x39b   : > { %v926_v45 = vadd.f32 0.4994258, %v925_v40  ;;  %v862_v40 = vmul.f32 0.5, %v1803_v56 }
 0x39c   : > { %v887_v46 = vmul.f32 %v886_v43, %v867_v61  ;;  %v876_v54 = vmul.f32 %v875_v51, %v867_v61  ;;  %v916_v60 = vmul.f32 %v915_v52, %v907_v59  ;;  %v863_v43 = vmul.f32 0.5, %v1805_v57 }
 0x39d   : > { %v927_v48 = vmul.f32 %v926_v45, %v907_v59 }
 0x39e   : > { %v888_v30 = vadd.f32 1.0, %v887_v46  ;;  %v877_v26 = vadd.f32 1.1283791, %v876_v54  ;;  %v917_v19 = vadd.f32 1.1283791, %v916_v60 }
 0x39f   : > { %v928_v50 = vadd.f32 1.0, %v927_v48 }
 0x3a0   : > { %1456 = vrcp.f32 %v888_v30  ;;  %v900_v0 = vand.u32 2147483648, %v888_v30  ;;  %v898_v2 = vand.u32 2147483647, %v888_v30  ;;  %vm894_vm4 = vweird.f32 %v888_v30 }
 0x3a1   : > { %1458 = vrcp.f32 %v928_v50  ;;  %v940_v4 = vand.u32 2147483648, %v928_v50  ;;  %v938_v6 = vand.u32 2147483647, %v928_v50  ;;  %vm934_vm15 = vweird.f32 %v928_v50 }
 0x3a2   : > { %v901_v61 = vor.u32 1.1754944e-38, %v900_v0  ;;  %v878_v59 = vmul.f32 %v877_v26, %v1808_v3  ;;  %vm899_vm7 = vcmp.eq.f32.partialorder %v898_v2, 8.507059e+37  ;;  %v918_v17 = vmul.f32 %v917_v19, %v1811_v5 }
 0x3a3   : > { %v941_v12 = vor.u32 1.1754944e-38, %v940_v4  ;;  %vm939_vm1 = vcmp.eq.f32.partialorder %v938_v6, 8.507059e+37 }
 0x3a6   : > { %v1457_v53 = vpop.eup %1456 }
 0x3a7   : > { %v1459_v55 = vpop.eup %1458  ;;  %v890_v58 = vmul.f32 %v1457_v53, %v888_v30  ;;  %vm895_vm2 = vweird.f32 %v1457_v53 }
 0x3a8   : > { %v930_v62 = vmul.f32 %v1459_v55, %v928_v50  ;;  %vm935_vm3 = vweird.f32 %v1459_v55  ;;  %vm896_vm5 = vmor %vm894_vm4, %vm895_vm2 }
 0x3a9   : > { %v891_v63 = vsub.f32 1.0, %v890_v58  ;;  %vm936_vm14 = vmor %vm934_vm15, %vm935_vm3 }
 0x3aa   : > { %v931_v1 = vsub.f32 1.0, %v930_v62 }
 0x3ab   : > { %v892_v27 = vmul.f32 %v1457_v53, %v891_v63 }
 0x3ac   : > { %v932_v23 = vmul.f32 %v1459_v55, %v931_v1 }
 0x3ad   : > { %v893_v11 = vadd.f32 %v1457_v53, %v892_v27 }
 0x3ae   : > { %v933_v14 = vadd.f32 %v1459_v55, %v932_v23 }
 0x3af   : > { %v897_v16 = vsel %vm896_vm5, %v1457_v53, %v893_v11 }
 0x3b0   : > { %v902_v18 = vsel %vm899_vm7, %v901_v61, %v897_v16  ;;  %v937_v28 = vsel %vm936_vm14, %v1459_v55, %v933_v14 }
 0x3b1   : > { %v903_v29 = vmul.f32 %v902_v18, %v878_v59  ;;  %v942_v34 = vsel %vm939_vm1, %v941_v12, %v937_v28 }
 0x3b2   : > { %v943_v36 = vmul.f32 %v942_v34, %v918_v17 }
 0x3b3   : > { %v1300_v37 = vclamps-f32 %v903_v29, 1.0 }
 0x3b4   : > { %v1301_v39 = vclamps-f32 %v943_v36, 1.0 }
 0x3b5   : > { %v946_v41 = vadd.f32 1.0, %v1300_v37 }
 0x3b6   : > { %v947_v3 = vadd.f32 1.0, %v1301_v39 }
 0x3b7   : > { %v948_v45 = vmul.f32 %v946_v41, %v862_v40 }
 0x3b8   : > { %v949_v46 = vmul.f32 %v947_v3, %v863_v43 }
 0x3b9   : > { %953 = vrot.lane.b32.xlu1 %v948_v45, %s1474_s21 }
 0x3ba   : > { %955 = vrot.lane.b32.xlu2 %v949_v46, %s1474_s21 }
 0x414   : > { %v956_v5 = vpop.permute.xlu2 %955 }
 0x415   : > { %v962_v47 = vsel %vm345_vm0, %v956_v5, 0.0 }
 0x416   : > { %v979_v32 = vmul.f32 %v962_v47, %v1576_v13  ;;  %v973_v53 = vmul.f32 %v962_v47, %v1580_v15 }
 0x42b   : > { %v954_v48 = vpop.permute.xlu1 %953 }
 0x42c   : > { %v1825_v49 = vsel %vm345_vm0, %v954_v48, %v956_v5  ;;  %v1828_v30 = vsel %vm345_vm0, 0.0, %v954_v48  ;;  %vm1939_vm0 = vcmask 1043456  }
 0x42d   : > { %v977_v56 = vmul.f32 %v1828_v30, %v1569_v9  ;;  %v1412_v57 = vpack.i.bf16 %v962_v47, %v1825_v49  ;;  %v978_v50 = vmul.f32 %v1825_v49, %v1604_v24  ;;  %v972_v52 = vmul.f32 %v1825_v49, %v1649_v44  ;;  %vm1940_vm2 = vmmov %vm1939_vm0 }
 0x42e   : > { %v975_v9 = vmul.f32 %v1825_v49, %v1608_v25  ;;  %v976_v24 = vmul.f32 %v962_v47, %v1593_v20  ;;  %v971_v55 = vmul.f32 %v1828_v30, %v1571_v10  ;;  %v974_v15 = vmul.f32 %v1828_v30, %v1598_v22  ;;  %vm1943_vm7 = vmmov %vm1939_vm0 }
 0x42f   : > { %1067 = vrot.lane.b32.xlu0 %v977_v56, %s1478_s25  ;;  %1413 = vrot.lane.b32.xlu2 %v1412_v57, %s1481_s28  ;;  %v1427_v51 = vpack.i.bf16 %v979_v32, %v978_v50  ;;  %v1437_v54 = vpack.i.bf16 %v973_v53, %v972_v52  ;;  %v966_v20 = vmul.f32 %v1825_v49, %v1627_v35  ;;  %v1080_v35 = vld [vmem:[%s1931_s6] sm:$0xf] }
 0x430   : > { %v1432_v13 = vpack.i.bf16 %v976_v24, %v975_v9  ;;  %v967_v25 = vmul.f32 %v962_v47, %v1623_v33  ;;  %v969_v44 = vmul.f32 %v1825_v49, %v1645_v42  ;;  %v970_v10 = vmul.f32 %v962_v47, %v1634_v38  ;;  %v1078_v38 = vld.sshfl [vmem:[#allocation1] sm:$0xff pattern:$0x75316420]  ;;  %v1079_v42 = vld.sshfl [vmem:[#allocation1 + $0x8] sm:$0xff pattern:$0x75316420] }
 0x431   : > { %1428 = vrot.lane.b32.xlu1 %v1427_v51, %s1478_s25  ;;  %v965_v22 = vmul.f32 %v1828_v30, %v1619_v31  ;;  %v968_v33 = vmul.f32 %v1828_v30, %v1596_v21  ;;  %1302 = vmatpush.msk.msra.mxu0 %vm1939_vm0, %v1078_v38  ;;  %v950_v24 = vld [vmem:[%s1930_s5] sm:$0xf] }
 0x432   : > { %v1447_v58 = vpack.i.bf16 %v967_v25, %v966_v20  ;;  %v1442_v60 = vpack.i.bf16 %v970_v10, %v969_v44  ;;  %1304 = vmatpush.msk.msra.mxu1 %vm1940_vm2, %v1079_v42 }
 0x437   : > { %1054 = vrot.lane.b32.xlu2 %v1828_v30, %s1481_s28  ;;  %1438 = vrot.lane.b32.xlu0 %v1437_v54, %s1483_s11  ;;  %v964_v54 = vmul.f32 %v1825_v49, %v1560_v7  ;;  %v963_v7 = vmul.f32 %v1828_v30, %v1562_v8 }
 0x439   : > { %1433 = vrot.lane.b32.xlu1 %v1432_v13, %s1480_s27 }
 0x43f   : > { %1418 = vrot.lane.b32.xlu2 %v1412_v57, %s1479_s26  ;;  %1031 = vrot.lane.b32.xlu0 %v971_v55, %s1483_s11 }
 0x441   : > { %1044 = vrot.lane.b32.xlu1 %v974_v15, %s1480_s27 }
 0x447   : > { %1018 = vrot.lane.b32.xlu2 %v1828_v30, %s1479_s26  ;;  %1448 = vrot.lane.b32.xlu0 %v1447_v58, %s1482_s29 }
 0x449   : > { %1443 = vrot.lane.b32.xlu1 %v1442_v60, %s1484_s12 }
 0x44f   : > { %1423 = vrot.lane.b32.xlu2 %v1412_v57, %s1485_s13  ;;  %995 = vrot.lane.b32.xlu0 %v965_v22, %s1482_s29  ;;  %s332_s29 = scalar_lea.vmem %s1934_s9, %s1310_s14 }
 0x451   : > { %1008 = vrot.lane.b32.xlu1 %v968_v33, %s1484_s12 }
 0x457   : > { %1083 = vperm.xlu2 %1370, %v1080_v35  }
 0x459   : > { %982 = vrot.lane.b32.xlu1 %v1828_v30, %s1485_s13 }
 0x489   : > { %v1414_v31 = vpop.permute.xlu2 %1413 }
 0x48a   : > { %v1416_v26 = vunpack.i.h.bf16 %v1414_v31  ;;  %v1415_v0 = vunpack.i.l.bf16 %v1414_v31 }
 0x48c   : > { %v1061_v6 = vsel %vm517_vm9, %v1415_v0, %v1416_v26 }
 0x491   : > { %v1055_v62 = vpop.permute.xlu2 %1054 }
 0x492   : > { %v1060_v23 = vsel %vm517_vm9, %v1055_v62, %v1415_v0 }
 0x499   : > { %v1419_v19 = vpop.permute.xlu2 %1418 }
 0x49a   : > { %v1421_v18 = vunpack.i.h.bf16 %v1419_v19  ;;  %v1420_v17 = vunpack.i.l.bf16 %v1419_v19 }
 0x49c   : > { %v1025_v37 = vsel %vm475_vm10, %v1420_v17, %v1421_v18 }
 0x4a1   : > { %v1068_v63 = vpop.permute.xlu0 %1067  ;;  %v1019_v34 = vpop.permute.xlu2 %1018 }
 0x4a2   : > { %v1024_v43 = vsel %vm475_vm10, %v1019_v34, %v1420_v17 }
 0x4a3   : > { %v1429_v21 = vpop.permute.xlu1 %1428 }
 0x4a4   : > { %v1431_v1 = vunpack.i.h.bf16 %v1429_v21  ;;  %v1430_v27 = vunpack.i.l.bf16 %v1429_v21 }
 0x4a6   : > { %v1073_v2 = vsel %vm531_vm6, %v1068_v63, %v1430_v27  ;;  %v1074_v4 = vsel %vm531_vm6, %v1430_v27, %v1431_v1  ;;  %vm1941_vm6 = vcmask 1039360  }
 0x4a7   : > { %1101 = vmatpush.msra.mxu0 %v1073_v2  ;;  %1121 = vmatpush.msra.mxu1 %v1074_v4  ;;  %vm1942_vm9 = vmmov %vm1941_vm6 }
 0x4a9   : > { %v1439_v11 = vpop.permute.xlu0 %1438  ;;  %1102 = vmatpush.msra.mxu0 %v1060_v23  ;;  %1122 = vmatpush.msra.mxu1 %v1061_v6  ;;  %v1424_v45 = vpop.permute.xlu2 %1423 }
 0x4aa   : > { %v1441_v14 = vunpack.i.h.bf16 %v1439_v11  ;;  %v1440_v59 = vunpack.i.l.bf16 %v1439_v11  ;;  %v1426_v57 = vunpack.i.h.bf16 %v1424_v45  ;;  %v1425_v50 = vunpack.i.l.bf16 %v1424_v45 }
 0x4ab   : > { %v1434_v61 = vpop.permute.xlu1 %1433 }
 0x4ac   : > { %v1436_v16 = vunpack.i.h.bf16 %v1434_v61  ;;  %v1435_v12 = vunpack.i.l.bf16 %v1434_v61  ;;  %v1038_v29 = vsel %vm492_vm11, %v1440_v59, %v1441_v14  ;;  %v989_v52 = vsel %vm1941_vm6, %v1425_v50, %v1426_v57 }
 0x4ae   : > { %v1051_v28 = vsel %vm506_vm8, %v1435_v12, %v1436_v16 }
 0x4af   : > { %1123 = vmatpush.msra.mxu1 %v1051_v28 }
 0x4b1   : > { %v1032_v36 = vpop.permute.xlu0 %1031  ;;  %1124 = vmatpush.msra.mxu1 %v1038_v29  ;;  %v1084_v49 = vpop.permute.xlu2 %1083 }
 0x4b2   : > { %v1037_v41 = vsel %vm492_vm11, %v1032_v36, %v1440_v59 }
 0x4b3   : > { %v1045_v39 = vpop.permute.xlu1 %1044  ;;  %1125 = vmatpush.msra.mxu1 %v1025_v37 }
 0x4b4   : > { %v1050_v40 = vsel %vm506_vm8, %v1045_v39, %v1435_v12  ;;  %vm1086_vm8 = vcmask 621568  }
 0x4b5   : > { %1103 = vmatpush.msra.mxu0 %v1050_v40 }
 0x4b7   : > { %1104 = vmatpush.msra.mxu0 %v1037_v41 }
 0x4b9   : > { %v1449_v3 = vpop.permute.xlu0 %1448  ;;  %1105 = vmatpush.msra.mxu0 %v1024_v43 }
 0x4ba   : > { %v1451_v5 = vunpack.i.h.bf16 %v1449_v3  ;;  %v1450_v47 = vunpack.i.l.bf16 %v1449_v3 }
 0x4bb   : > { %v1444_v46 = vpop.permute.xlu1 %1443 }
 0x4bc   : > { %v1446_v48 = vunpack.i.h.bf16 %v1444_v46  ;;  %v1445_v56 = vunpack.i.l.bf16 %v1444_v46  ;;  %v1002_v51 = vsel %vm447_vm13, %v1450_v47, %v1451_v5 }
 0x4be   : > { %v1015_v32 = vsel %vm464_vm12, %v1445_v56, %v1446_v48 }
 0x4bf   : > { %1126 = vmatpush.msra.mxu1 %v1015_v32 }
 0x4c1   : > { %1127 = vmatpush.msra.mxu1 %v1002_v51  ;;  %v996_v53 = vpop.permute.xlu0 %995 }
 0x4c2   : > { %v1001_v55 = vsel %vm447_vm13, %v996_v53, %v1450_v47 }
 0x4c3   : > { %v1009_v9 = vpop.permute.xlu1 %1008  ;;  %1128 = vmatpush.msra.mxu1 %v989_v52 }
 0x4c4   : > { %v1014_v13 = vsel %vm464_vm12, %v1009_v9, %v1445_v56 }
 0x4c5   : > { %1106 = vmatpush.msra.mxu0 %v1014_v13  ;;  %1129 = vmatpush.msra.mxu1 %v964_v54 }
 0x4c6   : > { %1305 = vmatmul.msk.f32.vlgmr.msra.gmra.mxu1 %vm1086_vm8, %v950_v24 }
 0x4c7   : > { %1107 = vmatpush.msra.mxu0 %v1001_v55 }
 0x4cb   : > { %v983_v15 = vpop.permute.xlu1 %982 }
 0x4cc   : > { %v988_v20 = vsel %vm1942_vm9, %v983_v15, %v1425_v50 }
 0x4cd   : > { %1108 = vmatpush.msra.mxu0 %v988_v20 }
 0x4cf   : > { %1109 = vmatpush.msra.mxu0 %v963_v7 }
 0x4d0   : > { %1303 = vmatmul.msk.f32.vlgmr.msra.gmra.mxu0 %vm1086_vm8, %v950_v24 }
 0x543   : > { %v1131_v25 = vpop.f32.mrf.mxu1 }
 0x544   : > { %v1903_v44 = vadd.f32 %v1131_v25, %v1084_v49 }
 0x546   : > { %v1137_v58 = vmul.f32 0.70710677, %v1903_v44 }
 0x548   : > { %v1178_v10 = vmul.f32 %v1137_v58, %v1137_v58 }
 0x54a   : > { %v1179_v60 = vmin.f32 %v1178_v10, 16.0 }
 0x54c   : > { %v1180_v22 = vmul.f32 2.1237322e-06, %v1179_v60  ;;  %v1191_v33 = vmul.f32 3.8918573e-05, %v1179_v60 }
 0x54d   : > { %v1111_v35 = vpop.f32.mrf.mxu0 }
 0x54e   : > { %v1181_v38 = vadd.f32 0.00028619796, %v1180_v22  ;;  %v1192_v42 = vadd.f32 0.001143296, %v1191_v33  ;;  %v1906_v31 = vadd.f32 %v1111_v35, %v1084_v49 }
 0x550   : > { %v1182_v62 = vmul.f32 %v1181_v38, %v1179_v60  ;;  %v1193_v63 = vmul.f32 %v1192_v42, %v1179_v60  ;;  %v1909_v8 = vmul.f32 0.70710677, %v1906_v31 }
 0x552   : > { %v1194_v30 = vadd.f32 0.014752088, %v1193_v63  ;;  %v1138_v21 = vmul.f32 %v1909_v8, %v1909_v8  ;;  %v1183_v26 = vadd.f32 0.0036580483, %v1182_v62 }
 0x554   : > { %v1195_v0 = vmul.f32 %v1194_v30, %v1179_v60  ;;  %v1139_v1 = vmin.f32 %v1138_v21, 16.0  ;;  %v1184_v19 = vmul.f32 %v1183_v26, %v1179_v60  ;;  %v1135_v30 = vmul.f32 0.5, %v1903_v44 }
 0x556   : > { %v1196_v27 = vadd.f32 0.112945676, %v1195_v0  ;;  %v1140_v2 = vmul.f32 2.1237322e-06, %v1139_v1  ;;  %v1151_v4 = vmul.f32 3.8918573e-05, %v1139_v1 }
 0x557   : > { %v1185_v16 = vadd.f32 0.05243302, %v1184_v19 }
 0x558   : > { %v1197_v23 = vmul.f32 %v1196_v27, %v1179_v60  ;;  %v1141_v6 = vadd.f32 0.00028619796, %v1140_v2  ;;  %v1152_v11 = vadd.f32 0.001143296, %v1151_v4 }
 0x559   : > { %v1186_v34 = vmul.f32 %v1185_v16, %v1179_v60 }
 0x55a   : > { %v1198_v61 = vadd.f32 0.4994258, %v1197_v23  ;;  %v1142_v14 = vmul.f32 %v1141_v6, %v1139_v1  ;;  %v1153_v59 = vmul.f32 %v1152_v11, %v1139_v1 }
 0x55b   : > { %v1187_v40 = vadd.f32 0.18741608, %v1186_v34 }
 0x55c   : > { %v1199_v12 = vmul.f32 %v1198_v61, %v1179_v60  ;;  %v1143_v18 = vadd.f32 0.0036580483, %v1142_v14  ;;  %v1154_v17 = vadd.f32 0.014752088, %v1153_v59 }
 0x55d   : > { %v1188_v5 = vmul.f32 %v1187_v40, %v1179_v60 }
 0x55e   : > { %v1200_v28 = vadd.f32 1.0, %v1199_v12  ;;  %v1155_v29 = vmul.f32 %v1154_v17, %v1139_v1  ;;  %v1144_v36 = vmul.f32 %v1143_v18, %v1139_v1 }
 0x55f   : > { %v1189_v51 = vadd.f32 1.1283791, %v1188_v5 }
 0x560   : > { %1460 = vrcp.f32 %v1200_v28  ;;  %v1156_v37 = vadd.f32 0.112945676, %v1155_v29  ;;  %v1145_v41 = vadd.f32 0.05243302, %v1144_v36  ;;  %v1212_v57 = vand.u32 2147483648, %v1200_v28 }
 0x561   : > { %v1210_v32 = vand.u32 2147483647, %v1200_v28  ;;  %vm1206_vm11 = vweird.f32 %v1200_v28  ;;  %v1190_v24 = vmul.f32 %v1189_v51, %v1137_v58 }
 0x562   : > { %v1157_v39 = vmul.f32 %v1156_v37, %v1139_v1  ;;  %v1146_v48 = vmul.f32 %v1145_v41, %v1139_v1  ;;  %v1213_v9 = vor.u32 1.1754944e-38, %v1212_v57 }
 0x563   : > { %vm1211_vm13 = vcmp.eq.f32.partialorder %v1210_v32, 8.507059e+37 }
 0x564   : > { %v1158_v43 = vadd.f32 0.4994258, %v1157_v39  ;;  %v1147_v53 = vadd.f32 0.18741608, %v1146_v48 }
 0x566   : > { %v1461_v3 = vpop.eup %1460  ;;  %v1159_v46 = vmul.f32 %v1158_v43, %v1139_v1  ;;  %v1148_v15 = vmul.f32 %v1147_v53, %v1139_v1  ;;  %v1134_v1 = vmul.f32 0.5, %v1906_v31 }
 0x567   : > { %v1202_v45 = vmul.f32 %v1461_v3, %v1200_v28  ;;  %vm1207_vm10 = vweird.f32 %v1461_v3 }
 0x568   : > { %v1160_v56 = vadd.f32 1.0, %v1159_v46  ;;  %vm1208_vm12 = vmor %vm1206_vm11, %vm1207_vm10  ;;  %v1149_v25 = vadd.f32 1.1283791, %v1148_v15 }
 0x569   : > { %v1203_v47 = vsub.f32 1.0, %v1202_v45 }
 0x56a   : > { %1462 = vrcp.f32 %v1160_v56  ;;  %v1172_v10 = vand.u32 2147483648, %v1160_v56  ;;  %v1170_v33 = vand.u32 2147483647, %v1160_v56  ;;  %vm1166_vm4 = vweird.f32 %v1160_v56 }
 0x56b   : > { %v1204_v50 = vmul.f32 %v1461_v3, %v1203_v47  ;;  %v1150_v58 = vmul.f32 %v1149_v25, %v1909_v8 }
 0x56c   : > { %v1173_v38 = vor.u32 1.1754944e-38, %v1172_v10  ;;  %vm1171_vm15 = vcmp.eq.f32.partialorder %v1170_v33, 8.507059e+37 }
 0x56d   : > { %v1205_v52 = vadd.f32 %v1461_v3, %v1204_v50 }
 0x56f   : > { %v1209_v54 = vsel %vm1208_vm12, %v1461_v3, %v1205_v52 }
 0x570   : > { %v1214_v13 = vsel %vm1211_vm13, %v1213_v9, %v1209_v54  ;;  %v1463_v55 = vpop.eup %1462 }
 0x571   : > { %v1215_v20 = vmul.f32 %v1214_v13, %v1190_v24  ;;  %v1162_v7 = vmul.f32 %v1463_v55, %v1160_v56  ;;  %vm1167_vm3 = vweird.f32 %v1463_v55 }
 0x572   : > { %vm1168_vm5 = vmor %vm1166_vm4, %vm1167_vm3 }
 0x573   : > { %v1163_v49 = vsub.f32 1.0, %v1162_v7  ;;  %v1307_v60 = vclamps-f32 %v1215_v20, 1.0 }
 0x575   : > { %v1164_v22 = vmul.f32 %v1463_v55, %v1163_v49  ;;  %v1219_v42 = vadd.f32 1.0, %v1307_v60 }
 0x577   : > { %v1165_v35 = vadd.f32 %v1463_v55, %v1164_v22  ;;  %v1221_v26 = vmul.f32 %v1219_v42, %v1135_v30 }
 0x579   : > { %v1169_v62 = vsel %vm1168_vm5, %v1463_v55, %v1165_v35  ;;  %v1224_v2 = vrot.slane %v1221_v26, 4 }
 0x57a   : > { %v1174_v63 = vsel %vm1171_vm15, %v1173_v38, %v1169_v62 }
 0x57b   : > { %v1175_v21 = vmul.f32 %v1174_v63, %v1150_v58 }
 0x57d   : > { %v1306_v0 = vclamps-f32 %v1175_v21, 1.0 }
 0x57f   : > { %v1218_v27 = vadd.f32 1.0, %v1306_v0 }
 0x581   : > { %v1220_v4 = vmul.f32 %v1218_v27, %v1134_v1 }
 0x583   : > { %v1225_v8 = vsel %vm1943_vm7, %v1220_v4, %v1224_v2 }
 0x584   : > { %1227 = vst [vmem:[%s332_s29] sm:$0xff] %v1225_v8 }
 0x585 PF: > { %s19_s30 = sadd.s32 1, %s1470_s30  }
 0x586   : > { %p16_p4 = scmp.ge.s32.totalorder %s19_s30, 4  }
 0x588   :  { %18 = sbr.rel (!%p16_p4) target bundleno = 1 (0x1), region = 86 }

</bundles_post_ra>
